<compile_context>
chip_gen: v5e
topology: v5e:2x2
jax: 0.10.0
libtpu: 0.0.40
codegen_flags: <defaults>
</compile_context>

<pallas_src>
import functools
import math

import jax
import jax.numpy as jnp
from jax.experimental import pallas as pl
from jax.experimental.pallas import tpu as pltpu


def _ntxent_tile_kernel(row_ref, part_ref, col_ref, out_ref, acc_ref, *,
                        inv_t, self_and_pad_corr):
    k = pl.program_id(1)
    nk = pl.num_programs(1)

    @pl.when(k == 0)
    def _init():
        acc_ref[...] = jnp.zeros_like(acc_ref)

    rows = row_ref[...]                                   # (tm, dp) f32, unit rows
    cols = col_ref[...]                                   # (tk, dp) f32, unit rows

    # NT matmul on the MXU: bf16 operands, f32 accumulation, contraction on D.
    sim = jax.lax.dot_general(
        rows.astype(jnp.bfloat16), cols.astype(jnp.bfloat16),
        dimension_numbers=(((1,), (1,)), ((), ())),
        preferred_element_type=jnp.float32)               # (tm, tk)

    # Shifted, overflow-safe softmax terms: sim <= 1 for unit-norm rows.
    e = jnp.exp((sim - 1.0) * inv_t)
    acc_ref[...] += jnp.sum(e, axis=1, keepdims=True)

    @pl.when(k == nk - 1)
    def _finalize():
        # Positive-pair score: f32 row-wise dot with the partner row.
        pos = jnp.sum(rows * part_ref[...], axis=1, keepdims=True)   # (tm, 1)
        # denom = sum_{j != i, j valid} exp((sim_ij - 1)/t):
        #   accumulated full-row sum minus the self term (exactly 1 in the
        #   shifted domain) and exp(-1/t) for each zero-padded column.
        denom = acc_ref[...] - self_and_pad_corr
        loss_rows = jnp.log(jnp.maximum(denom, 1e-30)) + inv_t * (1.0 - pos)
        out_ref[...] = jnp.broadcast_to(loss_rows, out_ref.shape)


def _round_up(x, m):
    return (x + m - 1) // m * m


def ntxent_loss(z1, z2, temperature=0.5, *, block_rows=256, block_cols=256):
    """Pallas TPU implementation of NTXentLoss.forward (returns scalar loss)."""
    assert z1.shape == z2.shape and z1.ndim == 2
    n, d = z1.shape
    two_n = 2 * n
    inv_t = 1.0 / float(temperature)

    dp = _round_up(d, 128)                       # pad feature dim for the MXU
    tm = _round_up(min(block_rows, two_n), 8)
    tk = _round_up(min(block_cols, two_n), 8)
    rows_pad = _round_up(two_n, math.lcm(tm, tk))
    n_pad_cols = rows_pad - two_n

    # Normalize once here (matches F.normalize eps), build r = [z1; z2] and the
    # partner matrix p = [z2; z1]; zero-pad rows/features.  Zero-padded rows
    # stay exactly zero, so each padded column contributes exactly exp(-1/t)
    # to every row sum -> removed analytically in-kernel.
    def _norm(z):
        z = z.astype(jnp.float32)
        return z / jnp.maximum(jnp.linalg.norm(z, axis=1, keepdims=True), 1e-12)

    z1n, z2n = _norm(z1), _norm(z2)
    pad = ((0, rows_pad - two_n), (0, dp - d))
    r = jnp.pad(jnp.concatenate([z1n, z2n], axis=0), pad)
    p = jnp.pad(jnp.concatenate([z2n, z1n], axis=0), pad)

    grid = (rows_pad // tm, rows_pad // tk)
    self_and_pad_corr = 1.0 + n_pad_cols * math.exp(-inv_t)

    kernel = functools.partial(
        _ntxent_tile_kernel, inv_t=inv_t, self_and_pad_corr=self_and_pad_corr)

    vmem_est = (2 * (2 * tm + tk) * dp * 4       # double-buffered f32 input tiles
                + 2 * tm * 128 * 4               # output tile (double-buffered)
                + tm * 4                         # accumulator scratch
                + 8 * tm * tk * 4                # sim/exp temporaries headroom
                + (2 << 20))
    vmem_limit = int(min(max(vmem_est, 16 << 20), 48 << 20))

    out = pl.pallas_call(
        kernel,
        out_shape=jax.ShapeDtypeStruct((rows_pad, 128), jnp.float32),
        grid_spec=pltpu.PrefetchScalarGridSpec(
            num_scalar_prefetch=0,
            grid=grid,
            in_specs=[
                pl.BlockSpec((tm, dp), lambda i, k: (i, 0)),   # row tile of r
                pl.BlockSpec((tm, dp), lambda i, k: (i, 0)),   # partner rows
                pl.BlockSpec((tk, dp), lambda i, k: (k, 0)),   # streamed column tile
            ],
            out_specs=pl.BlockSpec((tm, 128), lambda i, k: (i, 0)),
            scratch_shapes=[pltpu.VMEM((tm, 1), jnp.float32)],
        ),
        compiler_params=pltpu.CompilerParams(
            dimension_semantics=("parallel", "arbitrary"),
            vmem_limit_bytes=vmem_limit),
    )(r, p, r)

    # Mean over the 2N valid per-row losses (padded rows sliced away).
    return jnp.sum(out[:two_n, 0]) / jnp.float32(two_n)


def _reference_ntxent(z1, z2, temperature=0.5):
    """Pure-JAX f32 reference mirroring the PyTorch module exactly."""
    def norm(z):
        return z / jnp.maximum(jnp.linalg.norm(z, axis=1, keepdims=True), 1e-12)
    r = jnp.concatenate([norm(z1), norm(z2)], axis=0)
    sim = r @ r.T
    two_n = r.shape[0]
    n = two_n // 2
    idx = jnp.arange(two_n)
    pos = sim[idx, (idx + n) % two_n][:, None]
    self_mask = jnp.eye(two_n, dtype=bool)
    pos_mask = jnp.zeros((two_n, two_n), dtype=bool).at[idx, (idx + n) % two_n].set(True)
    neg_sum = jnp.sum(jnp.where(self_mask | pos_mask, 0.0, jnp.exp(sim / temperature)),
                      axis=1, keepdims=True)
    loss = -jnp.log(jnp.exp(pos / temperature) / (jnp.exp(pos / temperature) + neg_sum))
    return jnp.mean(loss)


# TODO(synk): print_flag / return_scores paths (full (2N, 2N-2) negatives
# matrix) are not exposed — the tiled kernel deliberately never materializes it.

if __name__ == "__main__":
    key = jax.random.PRNGKey(0)
    k1, k2 = jax.random.split(key)
    N, D = 40, 48  # small batch of embeddings; exercises row + feature padding
    z1 = jax.random.normal(k1, (N, D), dtype=jnp.float32)
    z2 = jax.random.normal(k2, (N, D), dtype=jnp.float32)

    # Small tiles so the test runs a real (3, 3) grid with accumulation.
    loss = ntxent_loss(z1, z2, temperature=0.5, block_rows=32, block_cols=32)
    loss = jax.block_until_ready(loss)

    ref = _reference_ntxent(z1, z2, temperature=0.5)
    # bf16 MXU operands perturb sim by ~1e-3 — tolerance relaxed accordingly.
    assert jnp.allclose(loss, ref, atol=1e-2, rtol=1e-2), (loss, ref)
    print("KERNEL_OK")
</pallas_src>

<mosaic_0001>
module attributes {stable_mosaic.version = 11 : i64} {
  func.func @_ntxent_tile_kernel(%arg0: i32, %arg1: i32, %arg2: memref<32x128xf32, #tpu.memory_space<vmem>>, %arg3: memref<32x128xf32, #tpu.memory_space<vmem>>, %arg4: memref<32x128xf32, #tpu.memory_space<vmem>>, %arg5: memref<32x128xf32, #tpu.memory_space<vmem>>, %arg6: memref<32x1xf32, #tpu.memory_space<vmem>>) attributes {dimension_semantics = [#tpu.dimension_semantics<parallel>, #tpu.dimension_semantics<arbitrary>], iteration_bounds = array<i64: 3, 3>, scalar_prefetch = 0 : i64, scratch_operands = 1 : i64, tpu.core_type = #tpu.core_type<tc>, window_params = [{transform_indices = @transform_0, window_bounds = array<i64: 32, 128>}, {transform_indices = @transform_1, window_bounds = array<i64: 32, 128>}, {transform_indices = @transform_2, window_bounds = array<i64: 32, 128>}, {transform_indices = @transform_3, window_bounds = array<i64: 32, 128>}]} {
    %c0_i32 = arith.constant 0 : i32
    %0 = arith.cmpi eq, %arg1, %c0_i32 : i32
    %1 = arith.extui %0 : i1 to i32
    %c0_i32_0 = arith.constant 0 : i32
    %2 = arith.cmpi ne, %1, %c0_i32_0 : i32
    scf.if %2 {
      %cst_12 = arith.constant 0.000000e+00 : f32
      %21 = vector.broadcast %cst_12 : f32 to vector<32x1xf32>
      %c0_13 = arith.constant 0 : index
      %c0_14 = arith.constant 0 : index
      %22 = vector.load %arg6[%c0_13, %c0_14] : memref<32x1xf32, #tpu.memory_space<vmem>>, vector<32x1xf32>
      tpu.vector_store %arg6[%c0_13, %c0_14], %21 {strides = array<i32>} : memref<32x1xf32, #tpu.memory_space<vmem>>, vector<32x1xf32>,
    } else {
    }
    %c0 = arith.constant 0 : index
    %c0_1 = arith.constant 0 : index
    %3 = vector.load %arg2[%c0, %c0_1] : memref<32x128xf32, #tpu.memory_space<vmem>>, vector<32x128xf32>
    %c0_2 = arith.constant 0 : index
    %c0_3 = arith.constant 0 : index
    %4 = vector.load %arg4[%c0_2, %c0_3] : memref<32x128xf32, #tpu.memory_space<vmem>>, vector<32x128xf32>
    %5 = arith.truncf %3 : vector<32x128xf32> to vector<32x128xbf16>
    %6 = arith.truncf %4 : vector<32x128xf32> to vector<32x128xbf16>
    %cst = arith.constant dense<0.000000e+00> : vector<32x32xf32>
    %7 = tpu.matmul %5, %6, %cst {dimension_numbers = #tpu.dot_dimension_numbers<[1], [1], [0], [0], [0, 0, 1, 0], [], []>} : vector<32x128xbf16>, vector<32x128xbf16>, vector<32x32xf32> -> vector<32x32xf32>
    %cst_4 = arith.constant 1.000000e+00 : f32
    %8 = vector.broadcast %cst_4 : f32 to vector<32x32xf32>
    %9 = arith.subf %7, %8 : vector<32x32xf32>
    %cst_5 = arith.constant 2.000000e+00 : f32
    %10 = vector.broadcast %cst_5 : f32 to vector<32x32xf32>
    %11 = arith.mulf %9, %10 : vector<32x32xf32>
    %12 = math.exp %11 : vector<32x32xf32>
    %c0_6 = arith.constant 0 : index
    %c0_7 = arith.constant 0 : index
    %13 = vector.load %arg6[%c0_6, %c0_7] : memref<32x1xf32, #tpu.memory_space<vmem>>, vector<32x1xf32>
    %cst_8 = arith.constant dense<0.000000e+00> : vector<32xf32>
    %14 = vector.multi_reduction <add>, %12, %cst_8 [1] : vector<32x32xf32> to vector<32xf32>
    %15 = vector.shape_cast %14 : vector<32xf32> to vector<32x1xf32>
    %16 = arith.addf %13, %15 : vector<32x1xf32>
    %c0_9 = arith.constant 0 : index
    %c0_10 = arith.constant 0 : index
    %17 = vector.load %arg6[%c0_9, %c0_10] : memref<32x1xf32, #tpu.memory_space<vmem>>, vector<32x1xf32>
    tpu.vector_store %arg6[%c0_9, %c0_10], %16 {strides = array<i32>} : memref<32x1xf32, #tpu.memory_space<vmem>>, vector<32x1xf32>,
    %c2_i32 = arith.constant 2 : i32
    %18 = arith.cmpi eq, %arg1, %c2_i32 : i32
    %19 = arith.extui %18 : i1 to i32
    %c0_i32_11 = arith.constant 0 : i32
    %20 = arith.cmpi ne, %19, %c0_i32_11 : i32
    scf.if %20 {
      %c0_12 = arith.constant 0 : index
      %c0_13 = arith.constant 0 : index
      %21 = vector.load %arg3[%c0_12, %c0_13] : memref<32x128xf32, #tpu.memory_space<vmem>>, vector<32x128xf32>
      %22 = arith.mulf %3, %21 : vector<32x128xf32>
      %cst_14 = arith.constant dense<0.000000e+00> : vector<32xf32>
      %23 = vector.multi_reduction <add>, %22, %cst_14 [1] : vector<32x128xf32> to vector<32xf32>
      %24 = vector.shape_cast %23 : vector<32xf32> to vector<32x1xf32>
      %c0_15 = arith.constant 0 : index
      %c0_16 = arith.constant 0 : index
      %25 = vector.load %arg6[%c0_15, %c0_16] : memref<32x1xf32, #tpu.memory_space<vmem>>, vector<32x1xf32>
      %cst_17 = arith.constant 3.1653645 : f32
      %26 = vector.broadcast %cst_17 : f32 to vector<32x1xf32>
      %27 = arith.subf %25, %26 : vector<32x1xf32>
      %cst_18 = arith.constant 1.000000e-30 : f32
      %28 = vector.broadcast %cst_18 : f32 to vector<32x1xf32>
      %29 = arith.maximumf %27, %28 : vector<32x1xf32>
      %30 = math.log %29 : vector<32x1xf32>
      %cst_19 = arith.constant 1.000000e+00 : f32
      %31 = vector.broadcast %cst_19 : f32 to vector<32x1xf32>
      %32 = arith.subf %31, %24 : vector<32x1xf32>
      %cst_20 = arith.constant 2.000000e+00 : f32
      %33 = vector.broadcast %cst_20 : f32 to vector<32x1xf32>
      %34 = arith.mulf %33, %32 : vector<32x1xf32>
      %35 = arith.addf %30, %34 : vector<32x1xf32>
      %36 = vector.shape_cast %35 : vector<32x1xf32> to vector<32x1xf32>
      %37 = vector.broadcast %36 : vector<32x1xf32> to vector<32x128xf32>
      %c0_21 = arith.constant 0 : index
      %c0_22 = arith.constant 0 : index
      %38 = vector.load %arg5[%c0_21, %c0_22] : memref<32x128xf32, #tpu.memory_space<vmem>>, vector<32x128xf32>
      tpu.vector_store %arg5[%c0_21, %c0_22], %37 {strides = array<i32>} : memref<32x128xf32, #tpu.memory_space<vmem>>, vector<32x128xf32>,
    } else {
    }
    return
  }
  func.func @transform_0(%arg0: i32, %arg1: i32) -> (i32, i32) {
    %c0_i32 = arith.constant 0 : i32
    %c0_i32_0 = arith.constant 0 : i32
    return %arg0, %c0_i32 : i32, i32
  }
  func.func @transform_1(%arg0: i32, %arg1: i32) -> (i32, i32) {
    %c0_i32 = arith.constant 0 : i32
    %c0_i32_0 = arith.constant 0 : i32
    return %arg0, %c0_i32 : i32, i32
  }
  func.func @transform_2(%arg0: i32, %arg1: i32) -> (i32, i32) {
    %c0_i32 = arith.constant 0 : i32
    %c0_i32_0 = arith.constant 0 : i32
    return %arg1, %c0_i32 : i32, i32
  }
  func.func @transform_3(%arg0: i32, %arg1: i32) -> (i32, i32) {
    %c0_i32 = arith.constant 0 : i32
    %c0_i32_0 = arith.constant 0 : i32
    return %arg0, %c0_i32 : i32, i32
  }
}

</mosaic_0001>

<bundles_post_ra>
// kernel: tpu_custom_call.1
= control target key start
LH: loop header
LB: loop body
LE: loop exit
PB: predicated region body
PF: predicated region fallthrough
CT: control target
= control target key end

     0   :  { %s1289_s0 = inlined_call_operand.hbm [shape: f32[96,128], index: 0, kind: input, shape index: {}]   ;;  %s1290_s1 = inlined_call_operand.hbm [shape: f32[96,128], index: 1, kind: input, shape index: {}]   ;;  %s1291_s2 = inlined_call_operand.hbm [shape: f32[96,128], index: 2, kind: input, shape index: {}]   ;;  %s1292_s3 = inlined_call_operand.hbm [shape: f32[96,128], index: 3, kind: output, shape index: {}]  }
   0x1   :  { %1302 = sst [smem:[#allocation19_spill]] %s1289_s0 }
   0x2   :  { %1303 = sst [smem:[#allocation20_spill]] %s1290_s1 }
   0x3   :  { %1304 = sst [smem:[#allocation21_spill]] %s1292_s3 }
   0x4   :  { %8 = vsyncpa [#allocation4], 0 }
   0x5   :  { %10 = vsyncpa [#allocation4 + $0x1], 0 }
   0x6   :  { %11 = vsyncpa [#allocation7], 0 }
   0x7   :  { %13 = vsyncpa [#allocation7 + $0x1], 0 }
   0x8   :  { %14 = vsyncpa [#allocation5], 0 }
   0x9   :  { %16 = vsyncpa [#allocation5 + $0x1], 0  ;;  %s1014_s12 = smov 0   ;;  %s1016_s13 = smov 0  }
   0xa   :  { %s1018_s14 = smov 0   ;;  %s1020_s15 = smov 0  }
   0xb   :  { %s1022_s16 = smov 0   ;;  %s1024_s17 = smov 0  }
   0xc   :  { %s1026_s18 = smov 0   ;;  %s1028_s19 = smov 0  }
   0xd   :  { %s1030_s20 = smov 0   ;;  %s1032_s21 = smov 0  }
   0xe   :  { %s1034_s22 = smov 0  }
   0xf LB: > { %1305 = sst [smem:[#allocation14_spill]] %s958_s15  ;;  %s1070_s23 = sadd.s32 4294967295, %s986_s22   ;;  %s986_s22 = sphi %s1034_s22, %s22_s22   ;;  %s982_s21 = sphi %s1032_s21, %s1339_s21   ;;  %s978_s20 = sphi %s1030_s20, %s1338_s20   ;;  %s974_s19 = sphi %s1028_s19, %s1337_s19   ;;  %s970_s18 = sphi %s1026_s18, %s1336_s18   ;;  %s966_s17 = sphi %s1024_s17, %s1335_s17   ;;  %s962_s16 = sphi %s1022_s16, %s1334_s16   ;;  %s958_s15 = sphi %s1020_s15, %s1333_s15   ;;  %s954_s14 = sphi %s1018_s14, %s1332_s14   ;;  %s950_s13 = sphi %s1016_s13, %s1331_s13   ;;  %s946_s12 = sphi %s1014_s12, %s1330_s12  }
  0x10   : > { %s591_s24 = sadd.s32 4294967294, %s986_s22   ;;  %p48_p0 = scmp.ne.s32.totalorder %s966_s17, %s962_s16 }
  0x11   : > { %p49_p1 = scmp.eq.s32.totalorder %s986_s22, 0  ;;  %p54_p2 = scmp.ne.s32.totalorder %s962_s16, %s958_s15 }
  0x12   : > { %p55_p3 = scmp.eq.s32.totalorder %s1070_s23, 0  ;;  %p130_p5 = scmp.eq.s32.totalorder %s1070_s23, 8 }
  0x13   : > { %p50_p4 = por %p49_p1, %p48_p0  ;;  %p136_p7 = scmp.eq.s32.totalorder %s591_s24, 8 }
  0x14   : > { %p1086_p6 = por %p55_p3, %p54_p2  ;;  %p1090_p8 = por %p130_p5, %p48_p0 }
  0x15   : > { %p1094_p9 = por %p136_p7, %p54_p2  ;;  %p651_p10 = scmp.lt.s32.totalorder %s986_s22, 9 }
  0x16   : > { %s1307_s28 = scalar_select %p1090_p8, 1, 0 }
  0x17   : > { %s1309_s29 = scalar_select %p1094_p9, 1, 0 }
  0x18   : > { %1308 = sst [smem:[#allocation15_spill]] %s1307_s28  ;;  %s156_s30 = sand.u32 1, %s966_s17  }
  0x19   : > { %1310 = sst [smem:[#allocation16_spill]] %s1309_s29  ;;  %s623_s4 = sshll.u32 %s982_s21, 5 }
  0x1a   : > { %s594_s5 = sshll.u32 %s156_s30, 5  ;;  %p1103_p11 = pnand %p651_p10, %p50_p4 }
  0x1b   : > { %s178_s7 = sand.u32 1, %s986_s22   ;;  %s1312_s1 = sld [smem:[#allocation20_spill]] }
  0x1c   : > { %s182_s11 = scalar_lea.vmem [#allocation6], %s594_s5  ;;  %p603_p12 = scmp.ge.s32.totalorder %s986_s22, 1 }
  0x1d   : > { %s190_s24 = sshll.u32 %s182_s11, 4  ;;  %s1112_s25 = scalar_lea.sflag [#allocation7], %s178_s7  ;;  %s191_s24 = int_to_ptr.vmem [resolvable:$true] %s190_s24 }
  0x1e   : > { %s1296_s29 = smov 128   ;;  %s1297_s15 = smov 8  }
  0x1f   : > { %p220_p13 = scmp.lt.s32.totalorder %s986_s22, 10  ;;  %s1314_s0 = sld [smem:[#allocation19_spill]] }
  0x20   : > { %s160_s11 = scalar_lea.vmem [#allocation3], %s594_s5  ;;  %s93_s7 = sadd.s32 1, %s954_s14 }
  0x21   : > { %s187_s10 = scalar_lea.hbm %s1312_s1, %s623_s4  ;;  %p1121_p0 = pnand %p603_p12, %p220_p13 }
  0x22   : > { %s188_s26 = sshll.u32 %s187_s10, 4  ;;  %s168_s1 = sshll.u32 %s160_s11, 4  ;;  %s189_s26 = int_to_ptr.hbm [resolvable:$true] %s188_s26  ;;  %s169_s1 = int_to_ptr.vmem [resolvable:$true] %s168_s1 }
  0x23   : > { %643 = dma.hbm_to_vmem [thread:$0]  (!%p1103_p11), %s189_s26, 512, %s191_s24, %s1112_s25, %s1296_s29, %s1296_s29, %s1297_s15  }
  0x24   : > { %s157_s26 = scalar_lea.sflag [#allocation4], %s156_s30  ;;  %s31_s24 = sadd.s32 1, %s978_s20 }
  0x25   : > { %s165_s10 = scalar_lea.hbm %s1314_s0, %s623_s4  ;;  %p32_p2 = scmp.ge.s32.totalorder %s31_s24, 3 }
  0x26   : > { %s166_s3 = sshll.u32 %s165_s10, 4  ;;  %p100_p4 = scmp.ne.s32.totalorder %s954_s14, %s950_s13  ;;  %s167_s3 = int_to_ptr.hbm [resolvable:$true] %s166_s3 }
  0x27   : > { %640 = dma.hbm_to_vmem [thread:$0]  (!%p1103_p11), %s167_s3, 512, %s169_s1, %s157_s26, %s1296_s29, %s1296_s29, %s1297_s15  }
  0x28   : > { %p106_p5 = scmp.ne.s32.totalorder %s950_s13, %s946_s12  ;;  %s1341_s24 = smov (%p32_p2, %s31_s24), 0 }
  0x29   : > { %1315 = sst [smem:[#allocation17_spill]] %s1341_s24  ;;  %s1316_s4 = sadd.s32 1, %s982_s21 }
  0x2a   : > { %s1343_s4 = smov (!%p32_p2, %s1316_s4), %s982_s21  ;;  %s90_s30 = ssub.s32 %s978_s20, %s1341_s24 }
  0x2b   : > { %p1148_p7 = por %p100_p4, %p49_p1  ;;  %p36_p11 = scmp.ge.s32.totalorder %s1343_s4, 3 }
  0x2c   : > { %p91_p12 = scmp.eq.s32.totalorder %s90_s30, 0  ;;  %p1154_p13 = por %p106_p5, %p55_p3 }
  0x2d   : > { %s202_s3 = sand.u32 1, %s954_s14   ;;  %s1345_s4 = smov (%p36_p11, %s1343_s4), 0 }
  0x2e   : > { %1319 = sst [smem:[#allocation18_spill]] %s1345_s4  ;;  %s38_s6 = ssub.s32 %s982_s21, %s1345_s4 }
  0x2f   : > { %s1162_s12 = scalar_select %p91_p12, %s954_s14, %s93_s7  }
  0x30   : > { %s600_s9 = sshll.u32 %s202_s3, 5  ;;  %p39_p1 = scmp.eq.s32.totalorder %s38_s6, 0 }
  0x31   : > { %s625_s10 = sshll.u32 %s978_s20, 5  ;;  %s204_s11 = scalar_lea.vmem [#allocation8], %s600_s9 }
  0x32   : > { %s212_s26 = sshll.u32 %s204_s11, 4  ;;  %s1320_s29 = sadd.s32 1, %s966_s17  ;;  %s213_s26 = int_to_ptr.vmem [resolvable:$true] %s212_s26 }
  0x33   : > { %s1170_s30 = scalar_select %p39_p1, %s966_s17, %s1320_s29  }
  0x34   : > { %s209_s24 = scalar_lea.hbm %s1291_s2, %s625_s10  ;;  %p644_p3 = pnand %p651_p10, %p1148_p7 }
  0x35   : > { %s210_s28 = sshll.u32 %s209_s24, 4  ;;  %s1321_s7 = smov 8   ;;  %s211_s28 = int_to_ptr.hbm [resolvable:$true] %s210_s28 }
  0x36   : > { %s1322_s4 = smov 128   ;;  %224 = sbr.rel (%p1121_p0) target bundleno = 635 (0x27b), region = 32 }
  0x37   : > { %646 = dma.hbm_to_vmem [thread:$0]  (!%p644_p3), %s211_s28, 512, %s213_s26, %s1112_s25, %s1322_s4, %s1322_s4, %s1321_s7  }
  0x38   : > { %s1186_s29 = sand.u32 (!%p1121_p0), 1, %s962_s16  }
  0x39   : > { %s604_s0 = sshll.u32 (!%p1121_p0), %s1186_s29, 5  ;;  %s227_s15 = scalar_lea.sflag (!%p1121_p0), [#allocation4], %s1186_s29 }
  0x3a   : > { %s1190_s24 = scalar_lea.vmem (!%p1121_p0), [#allocation3], %s604_s0 }
  0x3b   : > { %929 = dma.done.wait (%p1086_p6), %s227_s15, 512  }
  0x3c   : > { %931 = vsyncadd (%p1086_p6), %s227_s15, 4294966784  ;;  %s236_s25 = sand.u32 1, %s1070_s23   ;;  %s1197_s8 = scalar_lea.vmem [#allocation6], %s604_s0 }
  0x3d   : > { %s237_s28 = scalar_lea.sflag [#allocation7], %s236_s25 }
  0x3e   : > { %933 = dma.done.wait (%p1086_p6), %s237_s28, 512  }
  0x3f   : > { %935 = vsyncadd (%p1086_p6), %s237_s28, 4294966784  ;;  %s248_s4 = sand.u32 1, %s950_s13  }
  0x40   : > { %s606_s5 = sshll.u32 %s248_s4, 5 }
  0x41   : > { %s250_s3 = scalar_lea.vmem [#allocation8], %s606_s5 }
  0x42   : > { %937 = dma.done.wait (%p1154_p13), %s237_s28, 512  }
  0x43   : > { %939 = vsyncadd (%p1154_p13), %s237_s28, 4294966784  ;;  %s1208_s6 = scalar_lea.vmem [#allocation9], %s604_s0  ;;  %p608_p10 = scmp.ne.s32.totalorder %s970_s18, 0 }
  0x45   : > { %292 = sbr.rel (%p608_p10) target bundleno = 79 (0x4f), region = 48 }
  0x4a   : > { %vm293_vm0 = vcmask 7168   ;;  %v990_v0 = vmov 0.0  }
  0x4b   : > { %294 = vst.msk [vmem:[#allocation2] sm:$0xff] %vm293_vm0, %v990_v0 }
  0x4c   : > { %295 = vst.msk [vmem:[#allocation2 + $0x8] sm:$0xff] %vm293_vm0, %v990_v0 }
  0x4d   : > { %296 = vst.msk [vmem:[#allocation2 + $0x10] sm:$0xff] %vm293_vm0, %v990_v0 }
  0x4e   : > { %297 = vst.msk [vmem:[#allocation2 + $0x18] sm:$0xff] %vm293_vm0, %v990_v0 }
  0x4f PF: > { %v304_v1 = vld [vmem:[%s250_s3 + $0x10] sm:$0xff]  ;;  %v305_v2 = vld [vmem:[%s250_s3 + $0x18] sm:$0xff]  ;;  %v302_v4 = vld [vmem:[%s250_s3] sm:$0xff]  ;;  %vm349_vm1 = vcmask 261120   ;;  %vm366_vm2 = vcmask 7168   ;;  %p613_p6 = scmp.ne.s32.totalorder %s970_s18, 2 }
  0x50   : > { %v309_v3 = vpack.c.bf16 %v305_v2, %v304_v1  ;;  %v303_v5 = vld [vmem:[%s250_s3 + $0x8] sm:$0xff]  ;;  %v1212_v7 = vld [vmem:[%s1190_s24] sm:$0xff]  ;;  %v300_v9 = vld [vmem:[%s1190_s24 + $0x10] sm:$0xff] }
  0x51   : > { %v308_v6 = vpack.c.bf16 %v303_v5, %v302_v4  ;;  %v1215_v8 = vld [vmem:[%s1190_s24 + $0x8] sm:$0xff]  ;;  %v1219_v10 = vld [vmem:[%s1190_s24 + $0x18] sm:$0xff] }
  0x52   : > { %316 = vmatpush.bf16.xpose.msra.mxu0 %v309_v3  ;;  %627 = vmatpush.bf16.xpose.msra.mxu1 %v309_v3  ;;  %v306_v11 = vpack.c.bf16 %v1215_v8, %v1212_v7  ;;  %v307_v12 = vpack.c.bf16 %v1219_v10, %v300_v9  ;;  %v345_v37 = vld [vmem:[#allocation2] sm:$0xff] }
  0x53   : > { %v346_v43 = vld [vmem:[#allocation2 + $0x8] sm:$0xff] }
  0x54   : > { %v347_v38 = vld [vmem:[#allocation2 + $0x10] sm:$0xff] }
  0x55   : > { %v348_v44 = vld [vmem:[#allocation2 + $0x18] sm:$0xff] }
  0x5a   : > { %317 = vmatpush.bf16.xpose.msra.mxu0 %v308_v6  ;;  %628 = vmatpush.bf16.xpose.msra.mxu1 %v308_v6 }
  0x61   : > { %318 = vmatmul.bf16.vlgmr.msra.gmra.mxu0 %v306_v11  ;;  %323 = vmatmul.bf16.vlgmr.msra.gmra.mxu1 %v307_v12 }
  0xde   : > { %v319_v13 = vpop.f32.mrf.mxu0  ;;  %v324_v14 = vpop.f32.mrf.mxu1 }
  0xdf   : > { %v609_v15 = vadd.f32 -1.0, %v319_v13  ;;  %v611_v16 = vadd.f32 -1.0, %v324_v14 }
  0xe1   : > { %v333_v17 = vmul.f32 2.0, %v609_v15  ;;  %v335_v18 = vmul.f32 2.0, %v611_v16 }
  0xe3   : > { %v337_v19 = vmul.f32 1.442695, %v333_v17  ;;  %v341_v20 = vmul.f32 1.442695, %v335_v18 }
  0xe5   : > { %747 = vpow2.f32 %v337_v19 }
  0xe6   : > { %749 = vpow2.f32 %v341_v20  ;;  %v321_v21 = vpop.f32.mrf.mxu0  ;;  %v326_v22 = vpop.f32.mrf.mxu1 }
  0xe7   : > { %v610_v23 = vadd.f32 -1.0, %v321_v21  ;;  %v612_v24 = vadd.f32 -1.0, %v326_v22 }
  0xe9   : > { %v334_v25 = vmul.f32 2.0, %v610_v23  ;;  %v336_v26 = vmul.f32 2.0, %v612_v24 }
  0xeb   : > { %v748_v27 = vpop.eup %747  ;;  %v339_v28 = vmul.f32 1.442695, %v334_v25  ;;  %v343_v29 = vmul.f32 1.442695, %v336_v26 }
  0xec   : > { %v750_v30 = vpop.eup %749  ;;  %v350_v31 = vsel %vm349_vm1, %v748_v27, 0.0 }
  0xed   : > { %751 = vpow2.f32 %v339_v28  ;;  %v356_v32 = vsel %vm349_vm1, %v750_v30, 0.0  ;;  %351 = vadd.xlane.f32.xlu0 %v350_v31 }
  0xee   : > { %753 = vpow2.f32 %v343_v29  ;;  %357 = vadd.xlane.f32.xlu1 %v356_v32 }
  0xf3   : > { %v752_v33 = vpop.eup %751 }
  0xf4   : > { %v754_v34 = vpop.eup %753  ;;  %v353_v35 = vsel %vm349_vm1, %v752_v33, 0.0 }
  0xf5   : > { %v359_v36 = vsel %vm349_vm1, %v754_v34, 0.0  ;;  %354 = vadd.xlane.f32.xlu0 %v353_v35 }
  0xf6   : > { %360 = vadd.xlane.f32.xlu1 %v359_v36 }
 0x160   : > { %v352_v39 = vpop.xlane.xlu0 %351 }
 0x161   : > { %v358_v40 = vpop.xlane.xlu1 %357  ;;  %v362_v41 = vadd.f32 %v352_v39, %v345_v37 }
 0x162   : > { %v364_v42 = vadd.f32 %v358_v40, %v347_v38 }
 0x163   : > { %367 = vst.msk [vmem:[#allocation2] sm:$0xff] %vm366_vm2, %v362_v41 }
 0x164   : > { %369 = vst.msk [vmem:[#allocation2 + $0x10] sm:$0xff] %vm366_vm2, %v364_v42 }
 0x168   : > { %v355_v45 = vpop.xlane.xlu0 %354  ;;  %374 = sbr.rel (%p613_p6) target bundleno = 614 (0x266), region = 52 }
 0x169   : > { %v361_v46 = vpop.xlane.xlu1 %360  ;;  %v363_v47 = vadd.f32 %v355_v45, %v346_v43 }
 0x16a   : > { %v365_v48 = vadd.f32 %v361_v46, %v348_v44 }
 0x16b   : > { %368 = vst.msk [vmem:[#allocation2 + $0x8] sm:$0xff] %vm366_vm2, %v363_v47 }
 0x16c   : > { %370 = vst.msk [vmem:[#allocation2 + $0x18] sm:$0xff] %vm366_vm2, %v365_v48 }
 0x16d   : > { %v377_v49 = vld [vmem:[%s1197_s8 + $0x10] sm:$0xff]  ;;  %v375_v50 = vld [vmem:[%s1197_s8] sm:$0xff]  ;;  %v378_v53 = vld [vmem:[%s1197_s8 + $0x18] sm:$0xff]  ;;  %v991_v57 = vmov 0  }
 0x16e   : > { %v381_v51 = vmul.f32 %v377_v49, %v300_v9  ;;  %v379_v52 = vmul.f32 %v375_v50, %v1212_v7  ;;  %v376_v54 = vld [vmem:[%s1197_s8 + $0x8] sm:$0xff]  ;;  %v382_v55 = vmul.f32 %v378_v53, %v1219_v10  ;;  %756 = vset.pattern.permute.xlu0 %v991_v57  ;;  %757 = vset.pattern.permute.xlu1 %v991_v57  ;;  %v393_v58 = vld [vmem:[#allocation2 + $0x10] sm:$0xff]  ;;  %v391_v59 = vld [vmem:[#allocation2] sm:$0xff] }
 0x16f   : > { %v380_v56 = vmul.f32 %v376_v54, %v1215_v8  ;;  %755 = vset.pattern.permute.xlu2 %v991_v57  ;;  %v616_v60 = vadd.f32 -3.1653645, %v393_v58  ;;  %v614_v61 = vadd.f32 -3.1653645, %v391_v59 }
 0x170   : > { %387 = vadd.xlane.f32.xlu1 %v381_v51  ;;  %383 = vadd.xlane.f32.xlu0 %v379_v52 }
 0x171   : > { %v401_v62 = vmax.f32 %v616_v60, 1e-30  ;;  %v399_v0 = vmax.f32 %v614_v61, 1e-30 }
 0x172   : > { %v392_v1 = vld [vmem:[#allocation2 + $0x8] sm:$0xff] }
 0x173   : > { %v394_v63 = vld [vmem:[#allocation2 + $0x18] sm:$0xff]  ;;  %758 = vlog2.f32 %v401_v62  ;;  %v615_v3 = vadd.f32 -3.1653645, %v392_v1 }
 0x174   : > { %v617_v2 = vadd.f32 -3.1653645, %v394_v63  ;;  %760 = vlog2.f32 %v399_v0 }
 0x175   : > { %v400_v5 = vmax.f32 %v615_v3, 1e-30 }
 0x176   : > { %v402_v4 = vmax.f32 %v617_v2, 1e-30 }
 0x178   : > { %389 = vadd.xlane.f32.xlu1 %v382_v55  ;;  %385 = vadd.xlane.f32.xlu0 %v380_v56  ;;  %762 = vlog2.f32 %v402_v4 }
 0x179   : > { %v759_v6 = vpop.eup %758  ;;  %764 = vlog2.f32 %v400_v5 }
 0x17a   : > { %v761_v7 = vpop.eup %760  ;;  %v408_v10 = vmul.f32 0.6931472, %v759_v6 }
 0x17b   : > { %v404_v13 = vmul.f32 0.6931472, %v761_v7 }
 0x17e   : > { %v763_v16 = vpop.eup %762 }
 0x17f   : > { %v765_v19 = vpop.eup %764  ;;  %v410_v22 = vmul.f32 0.6931472, %v763_v16 }
 0x180   : > { %v406_v24 = vmul.f32 0.6931472, %v765_v19 }
 0x1e3   : > { %v388_v8 = vpop.xlane.xlu1 %387  ;;  %v384_v9 = vpop.xlane.xlu0 %383 }
 0x1e4   : > { %v413_v11 = vsub.f32 1.0, %v388_v8  ;;  %v411_v12 = vsub.f32 1.0, %v384_v9 }
 0x1e6   : > { %v417_v14 = vmul.f32 2.0, %v413_v11  ;;  %v415_v15 = vmul.f32 2.0, %v411_v12 }
 0x1e8   : > { %v421_v17 = vadd.f32 %v417_v14, %v408_v10  ;;  %v419_v18 = vadd.f32 %v415_v15, %v404_v13 }
 0x1ea   : > { %435 = vperm.xlu0 %756, %v421_v17   ;;  %425 = vperm.xlu2 %755, %v419_v18  }
 0x1eb   : > { %v390_v20 = vpop.xlane.xlu1 %389  ;;  %v386_v21 = vpop.xlane.xlu0 %385 }
 0x1ec   : > { %v414_v23 = vsub.f32 1.0, %v390_v20  ;;  %v412_v25 = vsub.f32 1.0, %v386_v21 }
 0x1ee   : > { %v418_v26 = vmul.f32 2.0, %v414_v23  ;;  %v416_v27 = vmul.f32 2.0, %v412_v25 }
 0x1f0   : > { %v422_v28 = vadd.f32 %v418_v26, %v410_v22  ;;  %v420_v29 = vadd.f32 %v416_v27, %v406_v24 }
 0x1f2   : > { %440 = vperm.xlu1 %757, %v422_v28   ;;  %430 = vperm.xlu2 %755, %v420_v29  }
 0x244   : > { %v426_v30 = vpop.permute.xlu2 %425 }
 0x245   : > { %443 = vst [vmem:[%s1208_s6] sm:$0xff] %v426_v30 }
 0x24c   : > { %v431_v31 = vpop.permute.xlu2 %430 }
 0x24d   : > { %444 = vst [vmem:[%s1208_s6 + $0x8] sm:$0xff] %v431_v31 }
 0x25c   : > { %v436_v32 = vpop.permute.xlu0 %435 }
 0x25d   : > { %445 = vst [vmem:[%s1208_s6 + $0x10] sm:$0xff] %v436_v32 }
 0x264   : > { %v441_v33 = vpop.permute.xlu1 %440 }
 0x265   : > { %446 = vst [vmem:[%s1208_s6 + $0x18] sm:$0xff] %v441_v33 }
 0x266 PF: > { %s626_s23 = sshll.u32 %s974_s19, 5  ;;  %s1324_s9 = sld [smem:[#allocation21_spill]] }
 0x267   : > { %s460_s11 = sshll.u32 %s1208_s6, 4  ;;  %s448_s7 = scalar_lea.sflag [#allocation5], %s1186_s29  ;;  %s461_s11 = int_to_ptr.vmem [resolvable:$true] %s460_s11 }
 0x26c   : > { %s459_s10 = scalar_lea.hbm %s1324_s9, %s626_s23  ;;  %s876_s19 = scalar_lea.hbm %s1324_s9, 96 }
 0x26d   : > { %s462_s26 = sshll.u32 %s459_s10, 4  ;;  %s463_s26 = int_to_ptr.hbm [resolvable:$true] %s462_s26 }
 0x26e   : > { %s870_s0 = sshra.s32 %s463_s26, 4  ;;  %s871_s0 = int_to_ptr.hbm [resolvable:$true] %s870_s0 }
 0x26f   : > { %s872_s15 = scalar_lea.hbm %s871_s0, 32  ;;  %p877_p5 = scmp.lt.s32.totalorder %s871_s0, %s1324_s9 }
 0x270   : > { %p873_p0 = scmp.ne.s32.totalorder %s871_s0, %s872_s15  ;;  %p878_p7 = scmp.lt.s32.totalorder %s876_s19, %s872_s15 }
 0x272   : > { %p874_p2 = pnand %p873_p0, %p1090_p8  ;;  %p879_p11 = por %p878_p7, %p877_p5 }
 0x274   : > { %p875_p4 = pneg %p874_p2 }
 0x276   : > { %p880_p12 = pnand %p879_p11, %p875_p4 }
 0x278   : > { %883 = shalt.err (!%p880_p12)
}
 0x279   : > { %s992_s29 = smov 128   ;;  %s993_s4 = smov 8  }
 0x27a   : > { %635 = dma.vmem_to_hbm [thread:$0]  (%p1090_p8), %s461_s11, 512, %s463_s26, %s448_s7, %s992_s29, %s992_s29, %s993_s4  }
 0x27b PF: > { %s1325_s5 = sld [smem:[#allocation14_spill]]  ;;  %p652_p13 = scmp.ge.s32.totalorder %s986_s22, 2 }
 0x27d   : > { %p648_p1 = pnand %p652_p13, %p1094_p9 }
 0x27f   : > { %p649_p3 = pneg %p648_p1 }
 0x281   : > { %s477_s6 = sand.u32 1, %s1325_s5  }
 0x282   : > { %s478_s23 = scalar_lea.sflag [#allocation5], %s477_s6 }
 0x283   : > { %941 = dma.done.wait (%p649_p3), %s478_s23, 512  }
 0x284   : > { %943 = vsyncadd (%p649_p3), %s478_s23, 4294966784  ;;  %s22_s22 = sadd.s32 1, %s986_s22   ;;  %s1327_s27 = smov %s1162_s12 }
 0x285   : > { %p19_p10 = scmp.ge.s32.totalorder %s22_s22, 11   ;;  %s1328_s1 = sld [smem:[#allocation17_spill]] }
 0x286   : > { %s1329_s10 = sld [smem:[#allocation18_spill]]  ;;  %s1330_s12 = smov %s950_s13 }
 0x287   : > { %s1331_s13 = smov %s954_s14  ;;  %s1332_s14 = smov %s1327_s27 }
 0x288   : > { %s1333_s15 = smov %s962_s16  ;;  %s1334_s16 = smov %s966_s17 }
 0x289   : > { %s1335_s17 = smov %s1170_s30  ;;  %s1336_s18 = smov %s978_s20 }
 0x28a   : > { %s1337_s19 = smov %s982_s21  ;;  %21 = sbr.rel (!%p19_p10) target bundleno = 15 (0xf), region = 109 }
 0x28b   : > { %s1338_s20 = smov %s1328_s1 }
 0x28c   : > { %s1339_s21 = smov %s1329_s10 }
 0x28f   :  { %484 = vsyncpa [#allocation4], 1 }
 0x290   :  { %486 = vsyncpa [#allocation4 + $0x1], 1 }
 0x291   :  { %487 = vsyncpa [#allocation7], 1 }
 0x292   :  { %489 = vsyncpa [#allocation7 + $0x1], 1 }
 0x293   :  { %490 = vsyncpa [#allocation5], 1 }
 0x294   :  { %492 = vsyncpa [#allocation5 + $0x1], 1 }

</bundles_post_ra>
